<compile_context>
chip_gen: v7x
topology: tpu7x:2x2x1
jax: 0.10.0
libtpu: 0.0.40
codegen_flags: <defaults>
</compile_context>

<pallas_src>
import functools

import jax
import jax.numpy as jnp
import numpy as np
from jax import lax
from jax.experimental import pallas as pl
from jax.experimental.pallas import tpu as pltpu

ALPHA = 1.0
LANE = 128
SUBLANE = 8
BIG = 1e30  # "infinite" squared distance for non-cluster lanes


def _round_up(n, m):
    return ((n + m - 1) // m) * m


def dec_kernel(x_ref, w1_ref, b1_ref, w_aug_ref, b_aug_ref, mu_sq_ref, out_ref,
               *, z_lanes, alpha):
    # ---- encoder: h = relu(x @ W1 + b1) -------------------------------------
    h = jnp.dot(x_ref[...], w1_ref[...], preferred_element_type=jnp.float32)
    h = jnp.maximum(h + b1_ref[...], 0.0)

    # ---- fused latent + cross term: one MXU contraction ---------------------
    #   t[:, :z_lanes]            = z = h @ W2 + b2
    #   t[:, z0:z0+K] (z0=z_lanes) = -2 * z . mu_k   (cross folded into w_aug)
    t = jnp.dot(h.astype(w_aug_ref.dtype), w_aug_ref[...],
                preferred_element_type=jnp.float32) + b_aug_ref[...]

    col = lax.broadcasted_iota(jnp.int32, t.shape, 1)
    is_z = col < z_lanes

    # ||z_i||^2 over the z lanes only.
    zm = jnp.where(is_z, t, 0.0)
    z_sq = jnp.sum(zm * zm, axis=1, keepdims=True)

    # ---- student-t soft assignment ------------------------------------------
    # mu_sq holds ||mu_k||^2 on cluster lanes and 1e30 elsewhere, so padded / z
    # lanes drop out of the normalization without an explicit mask.  Clamp d2
    # at 0: the expanded form can go slightly negative from f32 cancellation.
    d2 = jnp.maximum(z_sq + mu_sq_ref[...] + t, 0.0)
    q = pl.reciprocal(1.0 + d2 * (1.0 / alpha), approx=False)
    # Original module: q = q ** (alpha + 1.0) / 2.0 ; the /2 cancels under the
    # row normalization and for alpha == 1 the power is a cheap VPU square.
    if alpha + 1.0 == 2.0:
        q = q * q
    else:
        q = q ** (alpha + 1.0)

    row_sum = jnp.sum(q, axis=1, keepdims=True)
    qn = q * pl.reciprocal(row_sum, approx=False)

    # Packed store: z on the z lanes, normalized q on the cluster lanes.
    out_ref[...] = jnp.where(is_z, t, qn).astype(out_ref.dtype)


def dec_forward(x, w1, b1, w2, b2, mu, *, alpha=ALPHA, block_b=None,
                use_bf16_matmul=False):
    """x:(B,Din)  w1:(Din,H)  b1:(1,H)|(H,)  w2:(H,Z)  b2:(1,Z)|(Z,)  mu:(K,Z)."""
    B, D_in = x.shape
    H = w1.shape[1]
    Z = w2.shape[1]
    K = mu.shape[0]

    f32 = jnp.float32
    mm_dtype = jnp.bfloat16 if use_bf16_matmul else f32

    # Lane-dense padding of the contraction axes (zero padding is numerically
    # neutral through ReLU and the fused matmul).
    D_p = _round_up(D_in, LANE)
    H_p = _round_up(H, LANE)
    Z_p = _round_up(Z, LANE)
    K_p = _round_up(K, LANE)

    # Packed output when z and q fit one 128-lane slab (default DEC config).
    packed = (Z + K) <= LANE
    if packed:
        out_w = LANE
        z_lanes = Z
    else:
        out_w = Z_p + K_p
        z_lanes = Z_p

    def pad2(a, rows, cols, dtype=f32):
        a = jnp.asarray(a, f32)
        if a.ndim == 1:
            a = a.reshape(1, -1)
        out = jnp.zeros((rows, cols), f32)
        out = out.at[:a.shape[0], :a.shape[1]].set(a)
        return out.astype(dtype)

    w1_p = pad2(w1, D_p, H_p, mm_dtype)
    b1_p = pad2(b1, 1, H_p)

    w2_f = jnp.asarray(w2, f32)
    b2_f = jnp.asarray(b2, f32).reshape(1, -1)
    mu_f = jnp.asarray(mu, f32)

    # Fold the cross term (and its -2 scale) into the second-layer weights:
    #   z @ mu^T = h @ (w2 @ mu^T) + b2 @ mu^T
    w2mu = w2_f @ mu_f.T                       # (H, K)
    b2mu = b2_f @ mu_f.T                       # (1, K)

    w_aug = jnp.zeros((H_p, out_w), f32)
    w_aug = w_aug.at[:H, :Z].set(w2_f)
    w_aug = w_aug.at[:H, z_lanes:z_lanes + K].set(-2.0 * w2mu)
    w_aug = w_aug.astype(mm_dtype)

    b_aug = jnp.zeros((1, out_w), f32)
    b_aug = b_aug.at[:, :Z].set(b2_f)
    b_aug = b_aug.at[:, z_lanes:z_lanes + K].set(-2.0 * b2mu)

    mu_sq = jnp.full((1, out_w), BIG, f32)
    mu_sq = mu_sq.at[:, z_lanes:z_lanes + K].set(jnp.sum(mu_f * mu_f, axis=1)[None, :])

    # ---- VMEM-aware batch tile size (v7x: 64 MiB, v5e/v6e: 128 MiB) ---------
    try:
        vmem_bytes = int(pltpu.get_tpu_info().vmem_capacity_bytes)
    except Exception:  # pragma: no cover - older jax / tracing fallback
        vmem_bytes = 64 * 1024 * 1024
    vmem_limit = min(int(vmem_bytes * 3 // 4), 96 * 1024 * 1024)

    in_item = 2 if use_bf16_matmul else 4
    # Pallas double-buffers every input, even the constant-index_map weights.
    const_bytes = 2 * ((D_p * H_p + H_p * out_w) * in_item + (H_p + 2 * out_w) * 4)
    # Per-row: double-buffered x tile + out tile, plus f32 temps (h, t).
    per_row = 2 * (D_p * in_item + out_w * 4) + (H_p + out_w) * 4

    if block_b is None:
        # Enough grid steps for pipelining / megacore sharding; tile cap 512
        # rows (measured HBM roofline is flat past ~512) so B_p never rounds
        # the batch up by ~2x.
        steps = max(2, pl.cdiv(B, 512))
        tb = _round_up(pl.cdiv(B, steps), SUBLANE)
        tb = min(tb, 512)
        budget = max(vmem_limit - const_bytes, per_row * SUBLANE)
        while tb > SUBLANE and tb * per_row > budget:
            tb //= 2
        tb = _round_up(tb, SUBLANE)
    else:
        tb = _round_up(int(block_b), SUBLANE)
    tb = max(SUBLANE, min(tb, _round_up(B, SUBLANE)))

    B_p = _round_up(B, tb)
    x_p = pad2(x, B_p, D_p, mm_dtype)
    grid = (B_p // tb,)

    batch_map = lambda i: (i, 0)
    const_map = lambda i: (0, 0)     # weights stay resident across the grid

    out_full = pl.pallas_call(
        functools.partial(dec_kernel, z_lanes=z_lanes, alpha=alpha),
        out_shape=jax.ShapeDtypeStruct((B_p, out_w), f32),
        grid=grid,
        in_specs=[
            pl.BlockSpec((tb, D_p), batch_map),
            pl.BlockSpec((D_p, H_p), const_map),
            pl.BlockSpec((1, H_p), const_map),
            pl.BlockSpec((H_p, out_w), const_map),
            pl.BlockSpec((1, out_w), const_map),
            pl.BlockSpec((1, out_w), const_map),
        ],
        out_specs=pl.BlockSpec((tb, out_w), batch_map),
        compiler_params=pltpu.CompilerParams(
            dimension_semantics=("parallel",),
            vmem_limit_bytes=vmem_limit,
        ),
    )(x_p, w1_p, b1_p, w_aug, b_aug, mu_sq)

    z = out_full[:B, :Z]
    q = out_full[:B, z_lanes:z_lanes + K]
    return z, q


def dec_reference(x, w1, b1, w2, b2, mu, alpha=ALPHA):
    # Direct transcription of the PyTorch forward (same operator precedence).
    h = jnp.maximum(x @ w1 + b1, 0.0)
    z = h @ w2 + b2
    d2 = jnp.sum((z[:, None, :] - mu[None, :, :]) ** 2, axis=2)
    q = 1.0 / (1.0 + d2 / alpha)
    q = q ** (alpha + 1.0) / 2.0
    q = q / jnp.sum(q, axis=1, keepdims=True)
    return z, q


if __name__ == "__main__":
    # Small shapes consistent with DEC(input_dim, encodeLayer=[H], z_dim, n_clusters).
    B, D_in, H, Z, K = 256, 32, 64, 10, 10

    key = jax.random.PRNGKey(0)
    k1, k2, k3, k4, k5, k6 = jax.random.split(key, 6)

    x = jax.random.normal(k1, (B, D_in), dtype=jnp.float32)
    # Parameters in kernel layout (in, out) — equals PyTorch Linear weight^T.
    w1 = jax.random.normal(k2, (D_in, H), dtype=jnp.float32) * 0.1
    b1 = jax.random.normal(k3, (1, H), dtype=jnp.float32) * 0.01
    w2 = jax.random.normal(k4, (H, Z), dtype=jnp.float32) * 0.1
    b2 = jax.random.normal(k5, (1, Z), dtype=jnp.float32) * 0.01
    mu = jax.random.normal(k6, (K, Z), dtype=jnp.float32)

    z_ref, q_ref = dec_reference(x, w1, b1, w2, b2, mu)

    # f32 MXU path (auto tile heuristic -> tb=128, grid of 2 batch steps).
    z, q = jax.block_until_ready(dec_forward(x, w1, b1, w2, b2, mu))
    np.testing.assert_allclose(np.asarray(z), np.asarray(z_ref),
                               rtol=1e-5, atol=1e-5)
    np.testing.assert_allclose(np.asarray(q), np.asarray(q_ref),
                               rtol=1e-4, atol=1e-5)
    assert np.allclose(np.asarray(q).sum(axis=1), 1.0, atol=1e-5)

    # bf16 MXU path (f32 accumulation) — ~1e-3 relative error, looser check.
    z_bf, q_bf = jax.block_until_ready(
        dec_forward(x, w1, b1, w2, b2, mu, use_bf16_matmul=True))
    np.testing.assert_allclose(np.asarray(z_bf), np.asarray(z_ref),
                               rtol=5e-2, atol=5e-2)
    np.testing.assert_allclose(np.asarray(q_bf), np.asarray(q_ref),
                               rtol=5e-2, atol=5e-2)
    assert np.allclose(np.asarray(q_bf).sum(axis=1), 1.0, atol=1e-5)

    # TODO(synk): training utilities (fit/encodeBatch/kmeans init/KLD loss/
    # target_distribution) are host-side training logic and are not kernelized.
    print("KERNEL_OK")
</pallas_src>

<mosaic_0001>
module attributes {stable_mosaic.version = 11 : i64} {
  func.func @dec_kernel(%arg0: i32, %arg1: memref<128x128xf32, #tpu.memory_space<vmem>>, %arg2: memref<128x128xf32, #tpu.memory_space<vmem>>, %arg3: memref<1x128xf32, #tpu.memory_space<vmem>>, %arg4: memref<128x128xf32, #tpu.memory_space<vmem>>, %arg5: memref<1x128xf32, #tpu.memory_space<vmem>>, %arg6: memref<1x128xf32, #tpu.memory_space<vmem>>, %arg7: memref<128x128xf32, #tpu.memory_space<vmem>>) attributes {dimension_semantics = [#tpu.dimension_semantics<parallel>], iteration_bounds = array<i64: 2>, scalar_prefetch = 0 : i64, scratch_operands = 0 : i64, tpu.core_type = #tpu.core_type<tc>, window_params = [{transform_indices = @transform_0, window_bounds = array<i64: 128, 128>}, {pipeline_mode = #tpu.pipeline_mode<synchronous>, transform_indices = @transform_1, window_bounds = array<i64: 128, 128>}, {pipeline_mode = #tpu.pipeline_mode<synchronous>, transform_indices = @transform_2, window_bounds = array<i64: 1, 128>}, {pipeline_mode = #tpu.pipeline_mode<synchronous>, transform_indices = @transform_3, window_bounds = array<i64: 128, 128>}, {pipeline_mode = #tpu.pipeline_mode<synchronous>, transform_indices = @transform_4, window_bounds = array<i64: 1, 128>}, {pipeline_mode = #tpu.pipeline_mode<synchronous>, transform_indices = @transform_5, window_bounds = array<i64: 1, 128>}, {transform_indices = @transform_6, window_bounds = array<i64: 128, 128>}]} {
    %c0 = arith.constant 0 : index
    %c0_0 = arith.constant 0 : index
    %0 = vector.load %arg1[%c0, %c0_0] : memref<128x128xf32, #tpu.memory_space<vmem>>, vector<128x128xf32>
    %c0_1 = arith.constant 0 : index
    %c0_2 = arith.constant 0 : index
    %1 = vector.load %arg2[%c0_1, %c0_2] : memref<128x128xf32, #tpu.memory_space<vmem>>, vector<128x128xf32>
    %cst = arith.constant dense<0.000000e+00> : vector<128x128xf32>
    %2 = tpu.matmul %0, %1, %cst {dimension_numbers = #tpu.dot_dimension_numbers<[1], [0], [0], [1], [0, 0, 1, 1], [], []>} : vector<128x128xf32>, vector<128x128xf32>, vector<128x128xf32> -> vector<128x128xf32>
    %c0_3 = arith.constant 0 : index
    %c0_4 = arith.constant 0 : index
    %3 = vector.load %arg3[%c0_3, %c0_4] : memref<1x128xf32, #tpu.memory_space<vmem>>, vector<1x128xf32>
    %4 = vector.broadcast %3 : vector<1x128xf32> to vector<128x128xf32>
    %5 = arith.addf %2, %4 : vector<128x128xf32>
    %cst_5 = arith.constant 0.000000e+00 : f32
    %6 = vector.broadcast %cst_5 : f32 to vector<128x128xf32>
    %7 = arith.maximumf %5, %6 : vector<128x128xf32>
    %c0_6 = arith.constant 0 : index
    %c0_7 = arith.constant 0 : index
    %8 = vector.load %arg4[%c0_6, %c0_7] : memref<128x128xf32, #tpu.memory_space<vmem>>, vector<128x128xf32>
    %cst_8 = arith.constant dense<0.000000e+00> : vector<128x128xf32>
    %9 = tpu.matmul %7, %8, %cst_8 {dimension_numbers = #tpu.dot_dimension_numbers<[1], [0], [0], [1], [0, 0, 1, 1], [], []>} : vector<128x128xf32>, vector<128x128xf32>, vector<128x128xf32> -> vector<128x128xf32>
    %c0_9 = arith.constant 0 : index
    %c0_10 = arith.constant 0 : index
    %10 = vector.load %arg5[%c0_9, %c0_10] : memref<1x128xf32, #tpu.memory_space<vmem>>, vector<1x128xf32>
    %11 = vector.broadcast %10 : vector<1x128xf32> to vector<128x128xf32>
    %12 = arith.addf %9, %11 : vector<128x128xf32>
    %13 = tpu.iota {dimensions = array<i32: 1>} : vector<128x128xi32>
    %c10_i32 = arith.constant 10 : i32
    %14 = vector.broadcast %c10_i32 : i32 to vector<128x128xi32>
    %15 = arith.cmpi slt, %13, %14 : vector<128x128xi32>
    %cst_11 = arith.constant 0.000000e+00 : f32
    %16 = vector.broadcast %cst_11 : f32 to vector<128x128xf32>
    %17 = arith.select %15, %12, %16 : vector<128x128xi1>, vector<128x128xf32>
    %18 = arith.mulf %17, %17 : vector<128x128xf32>
    %cst_12 = arith.constant dense<0.000000e+00> : vector<128xf32>
    %19 = vector.multi_reduction <add>, %18, %cst_12 [1] : vector<128x128xf32> to vector<128xf32>
    %20 = vector.shape_cast %19 : vector<128xf32> to vector<128x1xf32>
    %c0_13 = arith.constant 0 : index
    %c0_14 = arith.constant 0 : index
    %21 = vector.load %arg6[%c0_13, %c0_14] : memref<1x128xf32, #tpu.memory_space<vmem>>, vector<1x128xf32>
    %22 = vector.broadcast %20 : vector<128x1xf32> to vector<128x128xf32>
    %23 = vector.broadcast %21 : vector<1x128xf32> to vector<128x128xf32>
    %24 = arith.addf %22, %23 : vector<128x128xf32>
    %25 = arith.addf %24, %12 : vector<128x128xf32>
    %cst_15 = arith.constant 0.000000e+00 : f32
    %26 = vector.broadcast %cst_15 : f32 to vector<128x128xf32>
    %27 = arith.maximumf %25, %26 : vector<128x128xf32>
    %cst_16 = arith.constant 1.000000e+00 : f32
    %28 = vector.broadcast %cst_16 : f32 to vector<128x128xf32>
    %29 = arith.mulf %27, %28 : vector<128x128xf32>
    %cst_17 = arith.constant 1.000000e+00 : f32
    %30 = vector.broadcast %cst_17 : f32 to vector<128x128xf32>
    %31 = arith.addf %30, %29 : vector<128x128xf32>
    %32 = tpu.reciprocal %31 : vector<128x128xf32> -> vector<128x128xf32>
    %33 = arith.mulf %32, %32 : vector<128x128xf32>
    %cst_18 = arith.constant dense<0.000000e+00> : vector<128xf32>
    %34 = vector.multi_reduction <add>, %33, %cst_18 [1] : vector<128x128xf32> to vector<128xf32>
    %35 = vector.shape_cast %34 : vector<128xf32> to vector<128x1xf32>
    %36 = tpu.reciprocal %35 : vector<128x1xf32> -> vector<128x1xf32>
    %37 = vector.broadcast %36 : vector<128x1xf32> to vector<128x128xf32>
    %38 = arith.mulf %33, %37 : vector<128x128xf32>
    %39 = arith.select %15, %12, %38 : vector<128x128xi1>, vector<128x128xf32>
    %c0_19 = arith.constant 0 : index
    %c0_20 = arith.constant 0 : index
    %40 = vector.load %arg7[%c0_19, %c0_20] : memref<128x128xf32, #tpu.memory_space<vmem>>, vector<128x128xf32>
    tpu.vector_store %arg7[%c0_19, %c0_20], %39 {strides = array<i32>} : memref<128x128xf32, #tpu.memory_space<vmem>>, vector<128x128xf32>,
    return
  }
  func.func @transform_0(%arg0: i32) -> (i32, i32) {
    %c0_i32 = arith.constant 0 : i32
    %c0_i32_0 = arith.constant 0 : i32
    return %arg0, %c0_i32 : i32, i32
  }
  func.func @transform_1(%arg0: i32) -> (i32, i32) {
    %c0_i32 = arith.constant 0 : i32
    %c0_i32_0 = arith.constant 0 : i32
    %c0_i32_1 = arith.constant 0 : i32
    return %c0_i32, %c0_i32_0 : i32, i32
  }
  func.func @transform_2(%arg0: i32) -> (i32, i32) {
    %c0_i32 = arith.constant 0 : i32
    %c0_i32_0 = arith.constant 0 : i32
    %c0_i32_1 = arith.constant 0 : i32
    return %c0_i32, %c0_i32_0 : i32, i32
  }
  func.func @transform_3(%arg0: i32) -> (i32, i32) {
    %c0_i32 = arith.constant 0 : i32
    %c0_i32_0 = arith.constant 0 : i32
    %c0_i32_1 = arith.constant 0 : i32
    return %c0_i32, %c0_i32_0 : i32, i32
  }
  func.func @transform_4(%arg0: i32) -> (i32, i32) {
    %c0_i32 = arith.constant 0 : i32
    %c0_i32_0 = arith.constant 0 : i32
    %c0_i32_1 = arith.constant 0 : i32
    return %c0_i32, %c0_i32_0 : i32, i32
  }
  func.func @transform_5(%arg0: i32) -> (i32, i32) {
    %c0_i32 = arith.constant 0 : i32
    %c0_i32_0 = arith.constant 0 : i32
    %c0_i32_1 = arith.constant 0 : i32
    return %c0_i32, %c0_i32_0 : i32, i32
  }
  func.func @transform_6(%arg0: i32) -> (i32, i32) {
    %c0_i32 = arith.constant 0 : i32
    %c0_i32_0 = arith.constant 0 : i32
    return %arg0, %c0_i32 : i32, i32
  }
}

</mosaic_0001>

<bundles_post_ra>
// kernel: tpu_custom_call.1
= control target key start
LH: loop header
LB: loop body
LE: loop exit
PB: predicated region body
PF: predicated region fallthrough
CT: control target
= control target key end

     0   :  { %11 = vsyncpa [#allocation3], 0  ;;  %s2180_s0 = inlined_call_operand.hbm [shape: f32[256,128], index: 0, kind: input, shape index: {}]   ;;  %s2181_s1 = inlined_call_operand.hbm [shape: f32[128,128], index: 1, kind: input, shape index: {}]   ;;  %s2182_s2 = inlined_call_operand.vmem [shape: f32[1,128], index: 2, kind: input, shape index: {}]   ;;  %s2183_s3 = inlined_call_operand.hbm [shape: f32[128,128], index: 3, kind: input, shape index: {}]   ;;  %s2184_s4 = inlined_call_operand.vmem [shape: f32[1,128], index: 4, kind: input, shape index: {}]   ;;  %s2185_s5 = inlined_call_operand.vmem [shape: f32[1,128], index: 5, kind: input, shape index: {}]   ;;  %s2186_s6 = inlined_call_operand.hbm [shape: f32[256,128], index: 6, kind: output, shape index: {}]  }
   0x1   :  { %13 = vsyncpa [#allocation3 + $0x1], 0 }
   0x2   :  { %14 = vsyncpa [#allocation6], 0 }
   0x3   :  { %15 = vsyncpa [#allocation4], 0 }
   0x4   :  { %17 = vsyncpa [#allocation4 + $0x1], 0  ;;  %s1640_s21 = smov 0   ;;  %s1642_s22 = smov 0  }
   0x5   :  { %s1644_s23 = smov 0   ;;  %s1646_s24 = smov 0  }
   0x6 LB: > { %s1661_s25 = sadd.s32 4294967295, %s1595_s24   ;;  %s1041_s26 = sadd.s32 4294967294, %s1595_s24   ;;  %s1595_s24 = sphi %s1646_s24, %s2206_s24   ;;  %s1591_s23 = sphi %s1644_s23, %s2205_s23   ;;  %s1587_s22 = sphi %s1642_s22, %s2204_s22   ;;  %s1583_s21 = sphi %s1640_s21, %s2203_s21  }
   0x7   : > { %p43_p0 = scmp.ne.s32.totalorder %s1587_s22, %s1583_s21  ;;  %p2187_p1 = scmp.eq.s32.totalorder %s1661_s25, 0 }
   0x8   : > { %p178_p3 = scmp.eq.s32.totalorder %s1041_s26, 1  ;;  %p1042_p5 = scmp.ge.s32.totalorder %s1595_s24, 1 }
   0x9   : > { %p1670_p4 = por %p2187_p1, %p43_p0  ;;  %p185_p7 = scmp.lt.s32.totalorder %s1595_s24, 3 }
   0xa   : > { %p1675_p6 = por %p178_p3, %p43_p0  ;;  %s1597_s30 = smov [#allocation5]  }
   0xb   : > { %s2190_s27 = scalar_select %p1670_p4, 1, 0 }
   0xc   : > { %s2191_s28 = scalar_select %p1675_p6, 1, 0 }
   0xd   : > { %p1680_p8 = pnand %p1042_p5, %p185_p7  ;;  %s197_s7 = sshll.u32 %s1597_s30, 4  ;;  %s1684_s7 = int_to_ptr.vmem [resolvable:$true] %s197_s7 }
   0xe   : > { %s1598_s9 = smov [#allocation7]   ;;  %s1439_s13 = scalar_lea.hbm %s2181_s1, 2048 }
   0xf   : > { %p1316_p9 = pneg %p1680_p8  ;;  %s213_s10 = sshll.u32 %s1598_s9, 4  ;;  %s1695_s10 = int_to_ptr.vmem [resolvable:$true] %s213_s10 }
  0x10   : > { %p1440_p12 = scmp.ne.s32.totalorder %s2181_s1, %s1439_s13  ;;  %p1446_p5 = scmp.lt.u32.totalorder %s1439_s13, %s2181_s1 }
  0x11   : > { %p1691_p11 = pnand %p1316_p9, %p2187_p1 }
  0x13   : > { %p1441_p13 = pneg %p1691_p11 }
  0x15   : > { %p1442_p0 = pnand %p1441_p13, %p1440_p12 }
  0x17   : > { %p1443_p3 = pneg %p1442_p0 }
  0x19   : > { %p1448_p7 = pnand %p1446_p5, %p1443_p3 }
  0x1b   : > { %1451 = shalt.err (!%p1448_p7)
}
  0x1c   : > { %s1452_s18 = scalar_lea.vmem %s1684_s7, 2048  ;;  %p1460_p2 = scmp.lt.s32.totalorder %s1684_s7, %s1684_s7 }
  0x1d   : > { %p1453_p9 = scmp.ne.s32.totalorder %s1684_s7, %s1452_s18  ;;  %p1461_p12 = scmp.lt.s32.totalorder %s1452_s18, %s1452_s18 }
  0x1f   : > { %p1455_p10 = pnand %p1453_p9, %p1441_p13  ;;  %p1462_p0 = por %p1461_p12, %p1460_p2 }
  0x21   : > { %p1456_p1 = pneg %p1455_p10 }
  0x23   : > { %p1463_p6 = pnand %p1462_p0, %p1456_p1 }
  0x25   : > { %1466 = shalt.err (!%p1463_p6)
}
  0x26   : > { %s1599_s19 = smov 128   ;;  %s1600_s20 = smov 8  }
  0x27   : > { %1319 = dma.hbm_to_vmem [thread:$0]  (!%p1691_p11), %s2181_s1, 2048, %s1684_s7, [#allocation6], %s1599_s19, %s1599_s19, %s1600_s20  }
  0x28   : > { %s1467_s12 = scalar_lea.hbm %s2183_s3, 2048 }
  0x29   : > { %p1468_p1 = scmp.ne.s32.totalorder %s2183_s3, %s1467_s12  ;;  %p1474_p10 = scmp.lt.u32.totalorder %s1467_s12, %s2183_s3 }
  0x2b   : > { %p1470_p2 = pnand %p1468_p1, %p1441_p13 }
  0x2d   : > { %p1471_p6 = pneg %p1470_p2 }
  0x2f   : > { %p1476_p3 = pnand %p1474_p10, %p1471_p6 }
  0x31   : > { %1479 = shalt.err (!%p1476_p3)
}
  0x32   : > { %s1480_s7 = scalar_lea.vmem %s1695_s10, 2048  ;;  %p1488_p12 = scmp.lt.s32.totalorder %s1695_s10, %s1695_s10 }
  0x33   : > { %p1481_p5 = scmp.ne.s32.totalorder %s1695_s10, %s1480_s7  ;;  %p1489_p0 = scmp.lt.s32.totalorder %s1480_s7, %s1480_s7 }
  0x35   : > { %p1483_p7 = pnand %p1481_p5, %p1441_p13  ;;  %p1490_p1 = por %p1489_p0, %p1488_p12 }
  0x37   : > { %p1484_p9 = pneg %p1483_p7 }
  0x39   : > { %p1491_p2 = pnand %p1490_p1, %p1484_p9 }
  0x3b   : > { %1494 = shalt.err (!%p1491_p2)
}
  0x3c   : > { %1322 = dma.hbm_to_vmem [thread:$0]  (!%p1691_p11), %s2183_s3, 2048, %s1695_s10, [#allocation6], %s1599_s19, %s1599_s19, %s1600_s20  }
  0x3d   : > { %s1756_s8 = sadd.s32 1, %s1595_s24   ;;  %s30_s26 = sadd.s32 1, %s1591_s23 }
  0x3e   : > { %s27_s30 = ssub.s32 %s1595_s24, %s1756_s8  ;;  %p37_p13 = scmp.ne.s32.totalorder %s1591_s23, %s1587_s22 }
  0x3f   : > { %p28_p6 = scmp.eq.s32.totalorder %s27_s30, 0  ;;  %p38_p10 = scmp.eq.s32.totalorder %s1595_s24, 0 }
  0x40   : > { %p2194_p3 = scmp.eq.s32.totalorder %s1661_s25, 1  ;;  %p1333_p7 = scmp.lt.s32.totalorder %s1595_s24, 2 }
  0x41   : > { %s1772_s11 = scalar_select %p28_p6, %s1591_s23, %s30_s26  }
  0x42   : > { %p1766_p5 = por %p2194_p3, %p37_p13  ;;  %p39_p9 = por %p38_p10, %p37_p13 }
  0x43   : > { %s233_s12 = sand.u32 1, %s1591_s23   ;;  %s1062_s10 = sshll.u32 %s1595_s24, 11 }
  0x44   : > { %s2195_s9 = scalar_select %p1766_p5, 1, 0 }
  0x45   : > { %s1046_s13 = sshll.u32 %s233_s12, 7  ;;  %s1779_s16 = scalar_lea.hbm %s2180_s0, %s1062_s10 }
  0x46   : > { %s237_s7 = scalar_lea.vmem [#allocation2], %s1046_s13  ;;  %p1783_p11 = pnand %p1333_p7, %p39_p9 }
  0x47   : > { %s244_s17 = sshll.u32 %s237_s7, 4  ;;  %s1787_s26 = scalar_lea.sflag [#allocation3], %s233_s12  ;;  %s1781_s17 = int_to_ptr.vmem [resolvable:$true] %s244_s17 }
  0x48   : > { %s1495_s30 = scalar_lea.hbm %s1779_s16, 2048  ;;  %p1497_p0 = pneg %p1783_p11 }
  0x49   : > { %p1496_p12 = scmp.ne.s32.totalorder %s1779_s16, %s1495_s30  ;;  %s1500_s14 = scalar_lea.hbm %s2180_s0, 4096 }
  0x4a   : > { %p1501_p13 = scmp.lt.u32.totalorder %s1779_s16, %s2180_s0  ;;  %p1502_p6 = scmp.lt.u32.totalorder %s1500_s14, %s1495_s30 }
  0x4b   : > { %p1498_p1 = pnand %p1497_p0, %p1496_p12  ;;  %p1504_p3 = scmp.lt.u32.totalorder %s1495_s30, %s1779_s16 }
  0x4c   : > { %p1503_p10 = por %p1502_p6, %p1501_p13 }
  0x4d   : > { %p1499_p2 = pneg %p1498_p1 }
  0x4e   : > { %p1505_p7 = por %p1504_p3, %p1503_p10 }
  0x50   : > { %p1506_p9 = pnand %p1505_p7, %p1499_p2 }
  0x52   : > { %1509 = shalt.err (!%p1506_p9)
}
  0x53   : > { %s1510_s12 = scalar_lea.vmem %s1781_s17, 2048  ;;  %s1601_s13 = smov [#allocation2]  }
  0x54   : > { %p1511_p12 = scmp.ne.s32.totalorder %s1781_s17, %s1510_s12  ;;  %s1515_s10 = sshll.u32 %s1601_s13, 4  ;;  %s1516_s10 = int_to_ptr.vmem [resolvable:$false] %s1515_s10 }
  0x55   : > { %s1517_s15 = scalar_lea.vmem %s1516_s10, 4096  ;;  %p1518_p4 = scmp.lt.s32.totalorder %s1781_s17, %s1516_s10 }
  0x56   : > { %p1513_p1 = pnand %p1511_p12, %p1497_p0  ;;  %p1519_p13 = scmp.lt.s32.totalorder %s1517_s15, %s1510_s12 }
  0x58   : > { %p1514_p5 = pneg %p1513_p1  ;;  %p1520_p6 = por %p1519_p13, %p1518_p4 }
  0x5a   : > { %p1521_p10 = pnand %p1520_p6, %p1514_p5 }
  0x5c   : > { %1524 = shalt.err (!%p1521_p10)
}
  0x5d   : > { %1326 = dma.hbm_to_vmem [thread:$0]  (!%p1783_p11), %s1779_s16, 2048, %s1781_s17, %s1787_s26, %s1599_s19, %s1599_s19, %s1600_s20  }
  0x5e   : > { %256 = sbr.rel (%p1680_p8) target bundleno = 942 (0x3ae), region = 44  ;;  %s1821_s30 = sand.u32 (!%p1680_p8), 1, %s1587_s22  }
  0x5f   : > { %s1050_s14 = sshll.u32 (!%p1680_p8), %s1821_s30, 7  ;;  %s259_s7 = scalar_lea.sflag (!%p1680_p8), [#allocation3], %s1821_s30 }
  0x60   : > { %s1827_s18 = scalar_lea.vmem (!%p1680_p8), [#allocation2], %s1050_s14  ;;  %p2197_p4 = scmp.ne.s32.totalorder (!%p1680_p8), %s2190_s27, 0 }
  0x65   : > { %1570 = dma.done.wait (%p2197_p4), %s259_s7, 2048  }
  0x66   : > { %1572 = vsyncadd (%p2197_p4), %s259_s7, 4294965248  ;;  %p2198_p5 = scmp.eq.s32.totalorder %s1661_s25, 0 }
  0x68   : > { %1574 = dma.done.wait (%p2198_p5), [#allocation6], 4096   ;;  %p2199_p8 = pmov %p2198_p5 }
  0x69   : > { %v317_v0 = vld [vmem:[#allocation5] sm:$0xff]  ;;  %v318_v1 = vld [vmem:[#allocation5 + $0x8] sm:$0xff]  ;;  %v319_v2 = vld [vmem:[#allocation5 + $0x10] sm:$0xff]  ;;  %s2051_s26 = scalar_lea.vmem [#allocation8], %s1050_s14  ;;  %s1063_s12 = sshll.u32 %s1661_s25, 11 }
  0x6a   : > { %1576 = vsyncadd (%p2199_p8), [#allocation6], 4294963200  ;;  %v1240_v3 = vpack.c.bf16 %v318_v1, %v317_v0  ;;  %v320_v4 = vld [vmem:[#allocation5 + $0x18] sm:$0xff]  ;;  %v321_v6 = vld [vmem:[#allocation5 + $0x20] sm:$0xff]  ;;  %s949_s13 = sshll.u32 %s2051_s26, 4  ;;  %s2126_s14 = scalar_lea.hbm %s2186_s6, %s1063_s12  ;;  %s2128_s13 = int_to_ptr.vmem [resolvable:$true] %s949_s13 }
  0x6b   : > { %v1244_v5 = vpack.c.bf16 %v320_v4, %v319_v2  ;;  %v322_v7 = vld [vmem:[#allocation5 + $0x28] sm:$0xff]  ;;  %v301_v9 = vld [vmem:[%s1827_s18] sm:$0xff]  ;;  %v323_v10 = vld [vmem:[#allocation5 + $0x30] sm:$0xff]  ;;  %s936_s25 = scalar_lea.sflag [#allocation4], %s1821_s30  ;;  %s1525_s7 = scalar_lea.vmem %s2128_s13, 2048 }
  0x6c   : > { %1241 = vmatprep.subr.bf16.mxu0 %v1240_v3  ;;  %v1248_v8 = vpack.c.bf16 %v322_v7, %v321_v6  ;;  %v324_v11 = vld [vmem:[#allocation5 + $0x38] sm:$0xff]  ;;  %1160 = vmatprep.mubr.f32.mxu0 %v301_v9  ;;  %v325_v13 = vld [vmem:[#allocation5 + $0x40] sm:$0xff]  ;;  %v326_v14 = vld [vmem:[#allocation5 + $0x48] sm:$0xff]  ;;  %p1526_p11 = scmp.ne.s32.totalorder %s2128_s13, %s1525_s7  ;;  %p2200_p0 = scmp.ne.s32.totalorder %s2195_s9, 0 }
  0x6d   : > { %1243 = vmatpush3.bf16.msra.mxu0 %v1240_v3  ;;  %v1252_v12 = vpack.c.bf16 %v324_v11, %v323_v10  ;;  %v501_v15 = vld [vmem:[#allocation7] sm:$0xff]  ;;  %v502_v16 = vld [vmem:[#allocation7 + $0x8] sm:$0xff]  ;;  %v503_v17 = vld [vmem:[#allocation7 + $0x10] sm:$0xff]  ;;  %v1256_v21 = vpack.c.bf16 %v326_v14, %v325_v13 }
  0x6e   : > { %1245 = vmatprep.subr.bf16.mxu0 %v1244_v5  ;;  %v504_v18 = vld [vmem:[#allocation7 + $0x18] sm:$0xff]  ;;  %v1272_v19 = vpack.c.bf16 %v502_v16, %v501_v15  ;;  %v505_v22 = vld [vmem:[#allocation7 + $0x20] sm:$0xff]  ;;  %v506_v23 = vld [vmem:[#allocation7 + $0x28] sm:$0xff]  ;;  %p1527_p2 = pnand %p1526_p11, %p2200_p0 }
  0x6f   : > { %v1276_v20 = vpack.c.bf16 %v504_v18, %v503_v17  ;;  %v327_v24 = vld [vmem:[#allocation5 + $0x50] sm:$0xff]  ;;  %v328_v25 = vld [vmem:[#allocation5 + $0x58] sm:$0xff]  ;;  %v1280_v26 = vpack.c.bf16 %v506_v23, %v505_v22  ;;  %v329_v30 = vld [vmem:[#allocation5 + $0x60] sm:$0xff] }
  0x70   : > { %1273 = vmatprep.subr.bf16.mxu1 %v1272_v19  ;;  %v1260_v27 = vpack.c.bf16 %v328_v25, %v327_v24  ;;  %v507_v28 = vld [vmem:[#allocation7 + $0x30] sm:$0xff]  ;;  %v508_v29 = vld [vmem:[#allocation7 + $0x38] sm:$0xff]  ;;  %v330_v31 = vld [vmem:[#allocation5 + $0x68] sm:$0xff]  ;;  %p1528_p3 = pneg %p1527_p2 }
  0x71   : > { %1247 = vmatpush3.bf16.msra.mxu0 %v1244_v5  ;;  %1275 = vmatpush3.bf16.msra.mxu1 %v1272_v19  ;;  %v1284_v32 = vpack.c.bf16 %v508_v29, %v507_v28  ;;  %v1264_v33 = vpack.c.bf16 %v330_v31, %v329_v30  ;;  %v509_v34 = vld [vmem:[#allocation7 + $0x40] sm:$0xff]  ;;  %v510_v35 = vld [vmem:[#allocation7 + $0x48] sm:$0xff]  ;;  %v331_v36 = vld [vmem:[#allocation5 + $0x70] sm:$0xff] }
  0x72   : > { %1249 = vmatprep.subr.bf16.mxu0 %v1248_v8  ;;  %1277 = vmatprep.subr.bf16.mxu1 %v1276_v20  ;;  %v332_v37 = vld [vmem:[#allocation5 + $0x78] sm:$0xff]  ;;  %v1288_v38 = vpack.c.bf16 %v510_v35, %v509_v34  ;;  %v511_v40 = vld [vmem:[#allocation7 + $0x50] sm:$0xff]  ;;  %v513_v43 = vld [vmem:[#allocation7 + $0x60] sm:$0xff] }
  0x73   : > { %v1268_v39 = vpack.c.bf16 %v332_v37, %v331_v36  ;;  %v512_v41 = vld [vmem:[#allocation7 + $0x58] sm:$0xff]  ;;  %v514_v44 = vld [vmem:[#allocation7 + $0x68] sm:$0xff]  ;;  %v303_v47 = vld [vmem:[%s1827_s18 + $0x10] sm:$0xff] }
  0x74   : > { %v1292_v42 = vpack.c.bf16 %v512_v41, %v511_v40  ;;  %v302_v45 = vld [vmem:[%s1827_s18 + $0x8] sm:$0xff]  ;;  %v1296_v46 = vpack.c.bf16 %v514_v44, %v513_v43  ;;  %v304_v48 = vld [vmem:[%s1827_s18 + $0x18] sm:$0xff]  ;;  %v305_v49 = vld [vmem:[%s1827_s18 + $0x20] sm:$0xff] }
  0x75   : > { %1251 = vmatpush3.bf16.msra.mxu0 %v1248_v8  ;;  %1279 = vmatpush3.bf16.msra.mxu1 %v1276_v20  ;;  %v306_v50 = vld [vmem:[%s1827_s18 + $0x28] sm:$0xff]  ;;  %v307_v51 = vld [vmem:[%s1827_s18 + $0x30] sm:$0xff]  ;;  %v308_v52 = vld [vmem:[%s1827_s18 + $0x38] sm:$0xff] }
  0x76   : > { %1253 = vmatprep.subr.bf16.mxu0 %v1252_v12  ;;  %1281 = vmatprep.subr.bf16.mxu1 %v1280_v26  ;;  %v309_v53 = vld [vmem:[%s1827_s18 + $0x40] sm:$0xff]  ;;  %v310_v54 = vld [vmem:[%s1827_s18 + $0x48] sm:$0xff]  ;;  %v311_v55 = vld [vmem:[%s1827_s18 + $0x50] sm:$0xff] }
  0x77   : > { %v312_v56 = vld [vmem:[%s1827_s18 + $0x58] sm:$0xff]  ;;  %v313_v57 = vld [vmem:[%s1827_s18 + $0x60] sm:$0xff]  ;;  %v314_v58 = vld [vmem:[%s1827_s18 + $0x68] sm:$0xff] }
  0x78   : > { %v315_v59 = vld [vmem:[%s1827_s18 + $0x70] sm:$0xff]  ;;  %v316_v60 = vld [vmem:[%s1827_s18 + $0x78] sm:$0xff]  ;;  %v1054_v0 = vld [vmem:[%s2182_s2] ss:$0 sm:$0xff]  ;;  %s1602_s18 = smov [#allocation8]  }
  0x79   : > { %1255 = vmatpush3.bf16.msra.mxu0 %v1252_v12  ;;  %1283 = vmatpush3.bf16.msra.mxu1 %v1280_v26  ;;  %v515_v61 = vld [vmem:[#allocation7 + $0x70] sm:$0xff]  ;;  %v516_v62 = vld [vmem:[#allocation7 + $0x78] sm:$0xff]  ;;  %s1529_s27 = sshll.u32 %s1602_s18, 4  ;;  %s1530_s27 = int_to_ptr.vmem [resolvable:$false] %s1529_s27 }
  0x7a   : > { %1257 = vmatprep.subr.bf16.mxu0 %v1256_v21  ;;  %1285 = vmatprep.subr.bf16.mxu1 %v1284_v32  ;;  %v1300_v63 = vpack.c.bf16 %v516_v62, %v515_v61  ;;  %s1531_s29 = scalar_lea.vmem %s1530_s27, 4096  ;;  %p1532_p7 = scmp.lt.s32.totalorder %s2128_s13, %s1530_s27 }
  0x7b   : > { %p1533_p9 = scmp.lt.s32.totalorder %s1531_s29, %s1525_s7 }
  0x7d   : > { %1259 = vmatpush3.bf16.msra.mxu0 %v1256_v21  ;;  %1287 = vmatpush3.bf16.msra.mxu1 %v1284_v32  ;;  %p1534_p12 = por %p1533_p9, %p1532_p7 }
  0x7e   : > { %1261 = vmatprep.subr.bf16.mxu0 %v1260_v27  ;;  %1289 = vmatprep.subr.bf16.mxu1 %v1288_v38 }
  0x7f   : > { %p1535_p1 = pnand %p1534_p12, %p1528_p3 }
  0x81   : > { %1263 = vmatpush3.bf16.msra.mxu0 %v1260_v27  ;;  %1291 = vmatpush3.bf16.msra.mxu1 %v1288_v38 }
  0x82   : > { %1265 = vmatprep.subr.bf16.mxu0 %v1264_v33  ;;  %1293 = vmatprep.subr.bf16.mxu1 %v1292_v42 }
  0x85   : > { %1267 = vmatpush3.bf16.msra.mxu0 %v1264_v33  ;;  %1295 = vmatpush3.bf16.msra.mxu1 %v1292_v42 }
  0x86   : > { %1269 = vmatprep.subr.bf16.mxu0 %v1268_v39  ;;  %1297 = vmatprep.subr.bf16.mxu1 %v1296_v46 }
  0x89   : > { %1271 = vmatpush3.bf16.msra.mxu0 %v1268_v39  ;;  %1299 = vmatpush3.bf16.msra.mxu1 %v1296_v46 }
  0x8a   : > { %1301 = vmatprep.subr.bf16.mxu1 %v1300_v63 }
  0x8c   : > { %1161 = vmatmul.mubr.f32.vlgmr.msra.gmra.mrb[0].mxu0 %v302_v45 }
  0x8d   : > { %1163 = vmatprep.mubr.f32.mxu0 %v303_v47  ;;  %1303 = vmatpush3.bf16.msra.mxu1 %v1300_v63 }
  0x90   : > { %1164 = vmatmul.mubr.f32.gmra.mrb[2].mxu0 %v304_v48 }
  0x91   : > { %1166 = vmatprep.mubr.f32.mxu0 %v305_v49  ;;  %v669_v49 = vlaneseq }
  0x94   : > { %1167 = vmatmul.mubr.f32.gmra.mrb[4].mxu0 %v306_v50  ;;  %v1856_v50 = vand.u32 127, %v669_v49 }
  0x95   : > { %1169 = vmatprep.mubr.f32.mxu0 %v307_v51  ;;  %v1861_v51 = vld [vmem:[%s2184_s4] ss:$0 sm:$0xff] }
  0x96   : > { %vm671_vm0 = vcmp.lt.s32.totalorder %v1856_v50, 10 }
  0x98   : > { %1170 = vmatmul.mubr.f32.gmra.mrb[6].mxu0 %v308_v52 }
  0x99   : > { %1172 = vmatprep.mubr.f32.mxu0 %v309_v53 }
  0x9c   : > { %1173 = vmatmul.mubr.f32.gmra.mrb[8].mxu0 %v310_v54 }
  0x9d   : > { %1175 = vmatprep.mubr.f32.mxu0 %v311_v55 }
  0xa0   : > { %1176 = vmatmul.mubr.f32.gmra.mrb[10].mxu0 %v312_v56 }
  0xa1   : > { %1178 = vmatprep.mubr.f32.mxu0 %v313_v57 }
  0xa4   : > { %1179 = vmatmul.mubr.f32.gmra.mrb[12].mxu0 %v314_v58 }
  0xa5   : > { %1181 = vmatprep.mubr.f32.mxu0 %v315_v59 }
  0xa8   : > { %1182 = vmatmul.mubr.f32.gmra.mrb[14].mxu0 %v316_v60 }
 0x15f   : > { %v1162_v1 = vpop.f32.mrb[0].mxu0 }
 0x160   : > { %v412_v2 = vadd.f32 %v1162_v1, %v1054_v0  ;;  %v406_v3 = vpop.f32.mrb[1].mxu0 }
 0x161   : > { %v407_v4 = vadd.f32 %v1054_v0, %v406_v3 }
 0x162   : > { %v486_v7 = vmax.f32 %v412_v2, 0.0 }
 0x163   : > { %v1165_v5 = vpop.f32.mrb[2].mxu0  ;;  %v485_v6 = vmax.f32 %v407_v4, 0.0 }
 0x164   : > { %v422_v8 = vadd.f32 %v1165_v5, %v1054_v0  ;;  %v416_v9 = vpop.f32.mrb[3].mxu0 }
 0x165   : > { %v417_v10 = vadd.f32 %v1054_v0, %v416_v9  ;;  %1216 = vmatprep.mubr.f32.mxu1 %v485_v6 }
 0x166   : > { %1217 = vmatmul.mubr.f32.vlgmr.msra.gmra.mrb[0].mxu1 %v486_v7  ;;  %v488_v13 = vmax.f32 %v422_v8, 0.0 }
 0x167   : > { %v487_v11 = vmax.f32 %v417_v10, 0.0  ;;  %v1168_v12 = vpop.f32.mrb[4].mxu0 }
 0x168   : > { %v432_v14 = vadd.f32 %v1168_v12, %v1054_v0  ;;  %v426_v15 = vpop.f32.mrb[5].mxu0 }
 0x169   : > { %v427_v16 = vadd.f32 %v1054_v0, %v426_v15  ;;  %1219 = vmatprep.mubr.f32.mxu1 %v487_v11 }
 0x16a   : > { %v490_v17 = vmax.f32 %v432_v14, 0.0  ;;  %1220 = vmatmul.mubr.f32.gmra.mrb[2].mxu1 %v488_v13 }
 0x16b   : > { %v489_v18 = vmax.f32 %v427_v16, 0.0  ;;  %v1171_v19 = vpop.f32.mrb[6].mxu0 }
 0x16c   : > { %v442_v20 = vadd.f32 %v1171_v19, %v1054_v0  ;;  %v436_v21 = vpop.f32.mrb[7].mxu0 }
 0x16d   : > { %v437_v22 = vadd.f32 %v1054_v0, %v436_v21  ;;  %1222 = vmatprep.mubr.f32.mxu1 %v489_v18 }
 0x16e   : > { %v492_v23 = vmax.f32 %v442_v20, 0.0  ;;  %1223 = vmatmul.mubr.f32.gmra.mrb[4].mxu1 %v490_v17 }
 0x16f   : > { %v491_v24 = vmax.f32 %v437_v22, 0.0  ;;  %v1174_v25 = vpop.f32.mrb[8].mxu0 }
 0x170   : > { %v452_v26 = vadd.f32 %v1174_v25, %v1054_v0  ;;  %v446_v27 = vpop.f32.mrb[9].mxu0 }
 0x171   : > { %v447_v28 = vadd.f32 %v1054_v0, %v446_v27  ;;  %1225 = vmatprep.mubr.f32.mxu1 %v491_v24 }
 0x172   : > { %v494_v29 = vmax.f32 %v452_v26, 0.0  ;;  %1226 = vmatmul.mubr.f32.gmra.mrb[6].mxu1 %v492_v23 }
 0x173   : > { %v493_v30 = vmax.f32 %v447_v28, 0.0  ;;  %v1177_v31 = vpop.f32.mrb[10].mxu0 }
 0x174   : > { %v462_v32 = vadd.f32 %v1177_v31, %v1054_v0  ;;  %v456_v33 = vpop.f32.mrb[11].mxu0 }
 0x175   : > { %v457_v34 = vadd.f32 %v1054_v0, %v456_v33  ;;  %1228 = vmatprep.mubr.f32.mxu1 %v493_v30 }
 0x176   : > { %v496_v35 = vmax.f32 %v462_v32, 0.0  ;;  %1229 = vmatmul.mubr.f32.gmra.mrb[8].mxu1 %v494_v29 }
 0x177   : > { %v495_v36 = vmax.f32 %v457_v34, 0.0  ;;  %v1180_v37 = vpop.f32.mrb[12].mxu0 }
 0x178   : > { %v472_v38 = vadd.f32 %v1180_v37, %v1054_v0  ;;  %v466_v39 = vpop.f32.mrb[13].mxu0 }
 0x179   : > { %v467_v40 = vadd.f32 %v1054_v0, %v466_v39  ;;  %1231 = vmatprep.mubr.f32.mxu1 %v495_v36 }
 0x17a   : > { %v498_v41 = vmax.f32 %v472_v38, 0.0  ;;  %1232 = vmatmul.mubr.f32.gmra.mrb[10].mxu1 %v496_v35 }
 0x17b   : > { %v497_v42 = vmax.f32 %v467_v40, 0.0  ;;  %v1183_v43 = vpop.f32.mrb[14].mxu0 }
 0x17c   : > { %v482_v44 = vadd.f32 %v1183_v43, %v1054_v0  ;;  %v476_v45 = vpop.f32.mrb[15].mxu0 }
 0x17d   : > { %v477_v46 = vadd.f32 %v1054_v0, %v476_v45  ;;  %1234 = vmatprep.mubr.f32.mxu1 %v497_v42 }
 0x17e   : > { %v500_v47 = vmax.f32 %v482_v44, 0.0  ;;  %1235 = vmatmul.mubr.f32.gmra.mrb[12].mxu1 %v498_v41 }
 0x17f   : > { %v499_v48 = vmax.f32 %v477_v46, 0.0 }
 0x181   : > { %1237 = vmatprep.mubr.f32.mxu1 %v499_v48 }
 0x182   : > { %1238 = vmatmul.mubr.f32.gmra.mrb[14].mxu1 %v500_v47 }
 0x239   : > { %v1218_v52 = vpop.f32.mrb[0].mxu1 }
 0x23a   : > { %v1865_v53 = vadd.f32 %v1218_v52, %v1861_v51  ;;  %v590_v54 = vpop.f32.mrb[1].mxu1 }
 0x23b   : > { %v1868_v55 = vadd.f32 %v1861_v51, %v590_v54 }
 0x23c   : > { %v673_v56 = vsel %vm671_vm0, %v1865_v53, 0.0 }
 0x23d   : > { %v1221_v57 = vpop.f32.mrb[2].mxu1  ;;  %v689_v58 = vmul.f32 %v673_v56, %v673_v56  ;;  %v672_v61 = vsel %vm671_vm0, %v1868_v55, 0.0 }
 0x23e   : > { %v1874_v59 = vadd.f32 %v1221_v57, %v1861_v51  ;;  %v600_v60 = vpop.f32.mrb[3].mxu1  ;;  %v688_v2 = vmul.f32 %v672_v61, %v672_v61 }
 0x23f   : > { %v1880_v62 = vadd.f32 %v1861_v51, %v600_v60  ;;  %706 = vadd.xlane.f32.xlu0 %v689_v58 }
 0x240   : > { %v675_v63 = vsel %vm671_vm0, %v1874_v59, 0.0 }
 0x241   : > { %v1224_v0 = vpop.f32.mrb[4].mxu1  ;;  %v691_v1 = vmul.f32 %v675_v63, %v675_v63  ;;  %v674_v5 = vsel %vm671_vm0, %v1880_v62, 0.0 }
 0x242   : > { %v1886_v3 = vadd.f32 %v1224_v0, %v1861_v51  ;;  %v610_v4 = vpop.f32.mrb[5].mxu1  ;;  %v690_v8 = vmul.f32 %v674_v5, %v674_v5 }
 0x243   : > { %v1892_v6 = vadd.f32 %v1861_v51, %v610_v4  ;;  %710 = vadd.xlane.f32.xlu1 %v691_v1  ;;  %704 = vadd.xlane.f32.xlu0 %v688_v2 }
 0x244   : > { %v677_v13 = vsel %vm671_vm0, %v1886_v3, 0.0 }
 0x245   : > { %v1227_v7 = vpop.f32.mrb[6].mxu1  ;;  %v676_v9 = vsel %vm671_vm0, %v1892_v6, 0.0  ;;  %v693_v16 = vmul.f32 %v677_v13, %v677_v13 }
 0x246   : > { %v1898_v10 = vadd.f32 %v1227_v7, %v1861_v51  ;;  %v620_v11 = vpop.f32.mrb[7].mxu1  ;;  %v692_v12 = vmul.f32 %v676_v9, %v676_v9 }
 0x247   : > { %v1904_v14 = vadd.f32 %v1861_v51, %v620_v11  ;;  %708 = vadd.xlane.f32.xlu1 %v690_v8 }
 0x248   : > { %712 = vadd.xlane.f32.xlu0 %v692_v12  ;;  %v679_v21 = vsel %vm671_vm0, %v1898_v10, 0.0 }
 0x249   : > { %v1230_v15 = vpop.f32.mrb[8].mxu1  ;;  %v678_v17 = vsel %vm671_vm0, %v1904_v14, 0.0  ;;  %v695_v24 = vmul.f32 %v679_v21, %v679_v21 }
 0x24a   : > { %v1910_v18 = vadd.f32 %v1230_v15, %v1861_v51  ;;  %v630_v19 = vpop.f32.mrb[9].mxu1  ;;  %v694_v20 = vmul.f32 %v678_v17, %v678_v17 }
 0x24b   : > { %v1916_v22 = vadd.f32 %v1861_v51, %v630_v19  ;;  %714 = vadd.xlane.f32.xlu1 %v693_v16 }
 0x24c   : > { %716 = vadd.xlane.f32.xlu0 %v694_v20  ;;  %v681_v29 = vsel %vm671_vm0, %v1910_v18, 0.0 }
 0x24d   : > { %v1233_v23 = vpop.f32.mrb[10].mxu1  ;;  %v680_v25 = vsel %vm671_vm0, %v1916_v22, 0.0  ;;  %v697_v32 = vmul.f32 %v681_v29, %v681_v29 }
 0x24e   : > { %v1922_v26 = vadd.f32 %v1233_v23, %v1861_v51  ;;  %v640_v27 = vpop.f32.mrb[11].mxu1  ;;  %v696_v28 = vmul.f32 %v680_v25, %v680_v25 }
 0x24f   : > { %v1928_v30 = vadd.f32 %v1861_v51, %v640_v27  ;;  %718 = vadd.xlane.f32.xlu1 %v695_v24 }
 0x250   : > { %720 = vadd.xlane.f32.xlu0 %v696_v28  ;;  %v683_v37 = vsel %vm671_vm0, %v1922_v26, 0.0 }
 0x251   : > { %v1236_v31 = vpop.f32.mrb[12].mxu1  ;;  %v682_v33 = vsel %vm671_vm0, %v1928_v30, 0.0  ;;  %v699_v40 = vmul.f32 %v683_v37, %v683_v37 }
 0x252   : > { %v1934_v34 = vadd.f32 %v1236_v31, %v1861_v51  ;;  %v650_v35 = vpop.f32.mrb[13].mxu1  ;;  %v698_v36 = vmul.f32 %v682_v33, %v682_v33 }
 0x253   : > { %v1940_v38 = vadd.f32 %v1861_v51, %v650_v35  ;;  %722 = vadd.xlane.f32.xlu1 %v697_v32 }
 0x254   : > { %724 = vadd.xlane.f32.xlu0 %v698_v36  ;;  %v685_v45 = vsel %vm671_vm0, %v1934_v34, 0.0 }
 0x255   : > { %v1239_v39 = vpop.f32.mrb[14].mxu1  ;;  %v684_v41 = vsel %vm671_vm0, %v1940_v38, 0.0  ;;  %v701_v47 = vmul.f32 %v685_v45, %v685_v45 }
 0x256   : > { %v1946_v42 = vadd.f32 %v1239_v39, %v1861_v51  ;;  %v660_v43 = vpop.f32.mrb[15].mxu1  ;;  %v700_v44 = vmul.f32 %v684_v41, %v684_v41 }
 0x257   : > { %v1952_v46 = vadd.f32 %v1861_v51, %v660_v43  ;;  %726 = vadd.xlane.f32.xlu1 %v699_v40  ;;  %v1963_v51 = vld [vmem:[%s2185_s5] ss:$0 sm:$0xff] }
 0x258   : > { %728 = vadd.xlane.f32.xlu0 %v700_v44  ;;  %v687_v52 = vsel %vm671_vm0, %v1946_v42, 0.0 }
 0x259   : > { %v686_v48 = vsel %vm671_vm0, %v1952_v46, 0.0  ;;  %v703_v54 = vmul.f32 %v687_v52, %v687_v52 }
 0x25a   : > { %v702_v49 = vmul.f32 %v686_v48, %v686_v48 }
 0x25b   : > { %730 = vadd.xlane.f32.xlu1 %v701_v47 }
 0x25c   : > { %732 = vadd.xlane.f32.xlu0 %v702_v49 }
 0x25f   : > { %734 = vadd.xlane.f32.xlu1 %v703_v54 }
 0x2cc   : > { %v707_v56 = vpop.xlane.xlu0 %706 }
 0x2cd   : > { %v744_v57 = vadd.f32 %v1963_v51, %v707_v56 }
 0x2cf   : > { %v760_v58 = vadd.f32 %v744_v57, %v1865_v53 }
 0x2d0   : > { %v711_v60 = vpop.xlane.xlu1 %710  ;;  %v705_v61 = vpop.xlane.xlu0 %704 }
 0x2d1   : > { %v776_v63 = vmax.f32 %v760_v58, 0.0  ;;  %v746_v0 = vadd.f32 %v1963_v51, %v711_v60  ;;  %v743_v1 = vadd.f32 %v1963_v51, %v705_v61 }
 0x2d3   : > { %v792_v2 = vadd.f32 1.0, %v776_v63  ;;  %v762_v4 = vadd.f32 %v746_v0, %v1874_v59  ;;  %v759_v5 = vadd.f32 %v743_v1, %v1868_v55 }
 0x2d4   : > { %v709_v7 = vpop.xlane.xlu1 %708 }
 0x2d5   : > { %1375 = vrcp.f32 %v792_v2  ;;  %v778_v8 = vmax.f32 %v762_v4, 0.0  ;;  %v775_v9 = vmax.f32 %v759_v5, 0.0  ;;  %v745_v11 = vadd.f32 %v1963_v51, %v709_v7  ;;  %v713_v12 = vpop.xlane.xlu0 %712 }
 0x2d6   : > { %v747_v13 = vadd.f32 %v1963_v51, %v713_v12 }
 0x2d7   : > { %v794_v15 = vadd.f32 1.0, %v778_v8  ;;  %v791_v16 = vadd.f32 1.0, %v775_v9  ;;  %v761_v17 = vadd.f32 %v745_v11, %v1880_v62 }
 0x2d8   : > { %v763_v19 = vadd.f32 %v747_v13, %v1892_v6  ;;  %v715_v20 = vpop.xlane.xlu1 %714 }
 0x2d9   : > { %1377 = vrcp.f32 %v794_v15  ;;  %v777_v21 = vmax.f32 %v761_v17, 0.0  ;;  %v748_v23 = vadd.f32 %v1963_v51, %v715_v20  ;;  %v717_v24 = vpop.xlane.xlu0 %716 }
 0x2da   : > { %1379 = vrcp.f32 %v791_v16  ;;  %v779_v25 = vmax.f32 %v763_v19, 0.0  ;;  %v749_v27 = vadd.f32 %v1963_v51, %v717_v24 }
 0x2db   : > { %v793_v28 = vadd.f32 1.0, %v777_v21  ;;  %v764_v29 = vadd.f32 %v748_v23, %v1886_v3 }
 0x2dc   : > { %v795_v31 = vadd.f32 1.0, %v779_v25  ;;  %v765_v32 = vadd.f32 %v749_v27, %v1904_v14  ;;  %v719_v33 = vpop.xlane.xlu1 %718 }
 0x2dd   : > { %1381 = vrcp.f32 %v793_v28  ;;  %v780_v35 = vmax.f32 %v764_v29, 0.0  ;;  %v750_v36 = vadd.f32 %v1963_v51, %v719_v33  ;;  %v721_v37 = vpop.xlane.xlu0 %720 }
 0x2de   : > { %v781_v39 = vmax.f32 %v765_v32, 0.0  ;;  %v751_v40 = vadd.f32 %v1963_v51, %v721_v37  ;;  %1383 = vrcp.f32 %v795_v31 }
 0x2df   : > { %v1376_v41 = vpop.eup %1375  ;;  %v796_v43 = vadd.f32 1.0, %v780_v35  ;;  %v766_v44 = vadd.f32 %v750_v36, %v1898_v10 }
 0x2e0   : > { %v797_v45 = vadd.f32 1.0, %v781_v39  ;;  %v767_v47 = vadd.f32 %v751_v40, %v1916_v22  ;;  %v723_v48 = vpop.xlane.xlu1 %722  ;;  %v1983_v49 = vmul.f32 %v1376_v41, %v1376_v41 }
 0x2e1   : > { %1385 = vrcp.f32 %v796_v43  ;;  %v782_v52 = vmax.f32 %v766_v44, 0.0  ;;  %v752_v54 = vadd.f32 %v1963_v51, %v723_v48  ;;  %v725_v56 = vpop.xlane.xlu0 %724 }
 0x2e2   : > { %v783_v57 = vmax.f32 %v767_v47, 0.0  ;;  %v753_v58 = vadd.f32 %v1963_v51, %v725_v56  ;;  %841 = vadd.xlane.f32.xlu1 %v1983_v49  ;;  %1387 = vrcp.f32 %v797_v45 }
 0x2e3   : > { %v1378_v60 = vpop.eup %1377  ;;  %v798_v61 = vadd.f32 1.0, %v782_v52  ;;  %v768_v63 = vadd.f32 %v752_v54, %v1910_v18 }
 0x2e4   : > { %v1380_v0 = vpop.eup %1379  ;;  %v799_v1 = vadd.f32 1.0, %v783_v57  ;;  %v769_v2 = vadd.f32 %v753_v58, %v1928_v30  ;;  %v727_v4 = vpop.xlane.xlu1 %726  ;;  %v1990_v5 = vmul.f32 %v1378_v60, %v1378_v60 }
 0x2e5   : > { %1389 = vrcp.f32 %v798_v61  ;;  %v784_v7 = vmax.f32 %v768_v63, 0.0  ;;  %v754_v8 = vadd.f32 %v1963_v51, %v727_v4  ;;  %v729_v9 = vpop.xlane.xlu0 %728  ;;  %v1993_v11 = vmul.f32 %v1380_v0, %v1380_v0 }
 0x2e6   : > { %v785_v12 = vmax.f32 %v769_v2, 0.0  ;;  %v755_v13 = vadd.f32 %v1963_v51, %v729_v9  ;;  %845 = vadd.xlane.f32.xlu1 %v1990_v5  ;;  %1391 = vrcp.f32 %v799_v1 }
 0x2e7   : > { %v1382_v15 = vpop.eup %1381  ;;  %v800_v16 = vadd.f32 1.0, %v784_v7  ;;  %v770_v17 = vadd.f32 %v754_v8, %v1922_v26  ;;  %839 = vadd.xlane.f32.xlu0 %v1993_v11 }
 0x2e8   : > { %v801_v19 = vadd.f32 1.0, %v785_v12  ;;  %v771_v20 = vadd.f32 %v755_v13, %v1940_v38  ;;  %v731_v21 = vpop.xlane.xlu1 %730  ;;  %v2000_v23 = vmul.f32 %v1382_v15, %v1382_v15  ;;  %v1384_v28 = vpop.eup %1383 }
 0x2e9   : > { %1393 = vrcp.f32 %v800_v16  ;;  %v786_v24 = vmax.f32 %v770_v17, 0.0  ;;  %v756_v25 = vadd.f32 %v1963_v51, %v731_v21  ;;  %v733_v27 = vpop.xlane.xlu0 %732  ;;  %v2010_v44 = vmul.f32 %v1384_v28, %v1384_v28 }
 0x2ea   : > { %v787_v29 = vmax.f32 %v771_v20, 0.0  ;;  %v757_v31 = vadd.f32 %v1963_v51, %v733_v27  ;;  %1395 = vrcp.f32 %v801_v19 }
 0x2eb   : > { %v1386_v32 = vpop.eup %1385  ;;  %v802_v33 = vadd.f32 1.0, %v786_v24  ;;  %v772_v35 = vadd.f32 %v756_v25, %v1934_v34  ;;  %843 = vadd.xlane.f32.xlu0 %v2000_v23 }
 0x2ec   : > { %v803_v36 = vadd.f32 1.0, %v787_v29  ;;  %v773_v37 = vadd.f32 %v757_v31, %v1952_v46  ;;  %v735_v39 = vpop.xlane.xlu1 %734  ;;  %v2007_v40 = vmul.f32 %v1386_v32, %v1386_v32  ;;  %v1388_v45 = vpop.eup %1387 }
 0x2ed   : > { %1397 = vrcp.f32 %v802_v33  ;;  %v788_v41 = vmax.f32 %v772_v35, 0.0  ;;  %v758_v43 = vadd.f32 %v1963_v51, %v735_v39  ;;  %v2017_v60 = vmul.f32 %v1388_v45, %v1388_v45 }
 0x2ee   : > { %v789_v47 = vmax.f32 %v773_v37, 0.0  ;;  %849 = vadd.xlane.f32.xlu1 %v2007_v40  ;;  %1399 = vrcp.f32 %v803_v36 }
 0x2ef   : > { %v1390_v48 = vpop.eup %1389  ;;  %v804_v52 = vadd.f32 1.0, %v788_v41  ;;  %v774_v54 = vadd.f32 %v758_v43, %v1946_v42  ;;  %847 = vadd.xlane.f32.xlu0 %v2010_v44 }
 0x2f0   : > { %v805_v56 = vadd.f32 1.0, %v789_v47  ;;  %v2015_v57 = vmul.f32 %v1390_v48, %v1390_v48  ;;  %v1392_v51 = vpop.eup %1391 }
 0x2f1   : > { %1401 = vrcp.f32 %v804_v52  ;;  %v790_v58 = vmax.f32 %v774_v54, 0.0  ;;  %v2023_v1 = vmul.f32 %v1392_v51, %v1392_v51 }
 0x2f2   : > { %853 = vadd.xlane.f32.xlu1 %v2015_v57  ;;  %1403 = vrcp.f32 %v805_v56 }
 0x2f3   : > { %v1394_v61 = vpop.eup %1393  ;;  %v806_v63 = vadd.f32 1.0, %v790_v58  ;;  %851 = vadd.xlane.f32.xlu0 %v2017_v60 }
 0x2f4   : > { %v2021_v0 = vmul.f32 %v1394_v61, %v1394_v61  ;;  %v1396_v2 = vpop.eup %1395 }
 0x2f5   : > { %1405 = vrcp.f32 %v806_v63  ;;  %v2029_v8 = vmul.f32 %v1396_v2, %v1396_v2 }
 0x2f6   : > { %857 = vadd.xlane.f32.xlu1 %v2021_v0 }
 0x2f7   : > { %v1398_v4 = vpop.eup %1397  ;;  %855 = vadd.xlane.f32.xlu0 %v2023_v1 }
 0x2f8   : > { %v2027_v7 = vmul.f32 %v1398_v4, %v1398_v4  ;;  %v1400_v9 = vpop.eup %1399 }
 0x2f9   : > { %v2035_v15 = vmul.f32 %v1400_v9, %v1400_v9 }
 0x2fa   : > { %861 = vadd.xlane.f32.xlu1 %v2027_v7 }
 0x2fb   : > { %v1402_v12 = vpop.eup %1401  ;;  %859 = vadd.xlane.f32.xlu0 %v2029_v8 }
 0x2fc   : > { %v2033_v13 = vmul.f32 %v1402_v12, %v1402_v12  ;;  %v1404_v16 = vpop.eup %1403 }
 0x2fd   : > { %v2041_v20 = vmul.f32 %v1404_v16, %v1404_v16 }
 0x2fe   : > { %865 = vadd.xlane.f32.xlu1 %v2033_v13 }
 0x2ff   : > { %v1406_v17 = vpop.eup %1405  ;;  %863 = vadd.xlane.f32.xlu0 %v2035_v15 }
 0x300   : > { %v2039_v19 = vmul.f32 %v1406_v17, %v1406_v17 }
 0x302   : > { %869 = vadd.xlane.f32.xlu1 %v2039_v19 }
 0x303   : > { %867 = vadd.xlane.f32.xlu0 %v2041_v20 }
 0x36f   : > { %v842_v21 = vpop.xlane.xlu1 %841 }
 0x370   : > { %1407 = vrcp.f32 %v842_v21 }
 0x373   : > { %v846_v24 = vpop.xlane.xlu1 %845 }
 0x374   : > { %1409 = vrcp.f32 %v846_v24  ;;  %v840_v25 = vpop.xlane.xlu0 %839 }
 0x375   : > { %1411 = vrcp.f32 %v840_v25 }
 0x378   : > { %v844_v27 = vpop.xlane.xlu0 %843 }
 0x379   : > { %1413 = vrcp.f32 %v844_v27 }
 0x37a   : > { %v1408_v28 = vpop.eup %1407 }
 0x37b   : > { %v888_v29 = vmul.f32 %v1408_v28, %v1983_v49  ;;  %v850_v31 = vpop.xlane.xlu1 %849 }
 0x37c   : > { %1415 = vrcp.f32 %v850_v31  ;;  %v848_v32 = vpop.xlane.xlu0 %847 }
 0x37d   : > { %v904_v33 = vsel %vm671_vm0, %v1865_v53, %v888_v29  ;;  %1417 = vrcp.f32 %v848_v32 }
 0x37e   : > { %v1410_v35 = vpop.eup %1409  ;;  %920 = vst [vmem:[%s2051_s26 + $0x8] sm:$0xff] %v904_v33 }
 0x37f   : > { %v1412_v36 = vpop.eup %1411  ;;  %v890_v37 = vmul.f32 %v1410_v35, %v1990_v5  ;;  %v854_v49 = vpop.xlane.xlu1 %853 }
 0x380   : > { %v887_v39 = vmul.f32 %v1412_v36, %v1993_v11  ;;  %1419 = vrcp.f32 %v854_v49  ;;  %v852_v41 = vpop.xlane.xlu0 %851 }
 0x381   : > { %v906_v53 = vsel %vm671_vm0, %v1874_v59, %v890_v37  ;;  %1421 = vrcp.f32 %v852_v41 }
 0x382   : > { %922 = vst [vmem:[%s2051_s26 + $0x18] sm:$0xff] %v906_v53  ;;  %v903_v43 = vsel %vm671_vm0, %v1868_v55, %v887_v39 }
 0x383   : > { %v1414_v45 = vpop.eup %1413  ;;  %919 = vst [vmem:[%s2051_s26] sm:$0xff] %v903_v43  ;;  %v858_v47 = vpop.xlane.xlu1 %857 }
 0x384   : > { %v889_v5 = vmul.f32 %v1414_v45, %v2000_v23  ;;  %1423 = vrcp.f32 %v858_v47  ;;  %v856_v11 = vpop.xlane.xlu0 %855 }
 0x385   : > { %1425 = vrcp.f32 %v856_v11 }
 0x386   : > { %v1416_v48 = vpop.eup %1415  ;;  %v905_v59 = vsel %vm671_vm0, %v1880_v62, %v889_v5 }
 0x387   : > { %v1418_v52 = vpop.eup %1417  ;;  %921 = vst [vmem:[%s2051_s26 + $0x10] sm:$0xff] %v905_v59  ;;  %v892_v54 = vmul.f32 %v1416_v48, %v2007_v40  ;;  %v862_v55 = vpop.xlane.xlu1 %861 }
 0x388   : > { %v891_v56 = vmul.f32 %v1418_v52, %v2010_v44  ;;  %1427 = vrcp.f32 %v862_v55  ;;  %v860_v58 = vpop.xlane.xlu0 %859 }
 0x389   : > { %v908_v23 = vsel %vm671_vm0, %v1886_v3, %v892_v54  ;;  %1429 = vrcp.f32 %v860_v58 }
 0x38a   : > { %v1420_v51 = vpop.eup %1419  ;;  %924 = vst [vmem:[%s2051_s26 + $0x28] sm:$0xff] %v908_v23  ;;  %v907_v62 = vsel %vm671_vm0, %v1892_v6, %v891_v56 }
 0x38b   : > { %v1422_v61 = vpop.eup %1421  ;;  %923 = vst [vmem:[%s2051_s26 + $0x20] sm:$0xff] %v907_v62  ;;  %v894_v40 = vmul.f32 %v1420_v51, %v2015_v57  ;;  %v866_v44 = vpop.xlane.xlu1 %865 }
 0x38c   : > { %v893_v63 = vmul.f32 %v1422_v61, %v2017_v60  ;;  %1431 = vrcp.f32 %v866_v44  ;;  %v864_v2 = vpop.xlane.xlu0 %863 }
 0x38d   : > { %v910_v3 = vsel %vm671_vm0, %v1898_v10, %v894_v40  ;;  %1433 = vrcp.f32 %v864_v2 }
 0x38e   : > { %v1424_v4 = vpop.eup %1423  ;;  %926 = vst [vmem:[%s2051_s26 + $0x38] sm:$0xff] %v910_v3  ;;  %v909_v6 = vsel %vm671_vm0, %v1904_v14, %v893_v63 }
 0x38f   : > { %v1426_v9 = vpop.eup %1425  ;;  %925 = vst [vmem:[%s2051_s26 + $0x30] sm:$0xff] %v909_v6  ;;  %v896_v57 = vmul.f32 %v1424_v4, %v2021_v0  ;;  %v870_v60 = vpop.xlane.xlu1 %869 }
 0x390   : > { %v895_v12 = vmul.f32 %v1426_v9, %v2023_v1  ;;  %1435 = vrcp.f32 %v870_v60  ;;  %v868_v16 = vpop.xlane.xlu0 %867 }
 0x391   : > { %v912_v10 = vsel %vm671_vm0, %v1910_v18, %v896_v57  ;;  %1437 = vrcp.f32 %v868_v16 }
 0x392   : > { %v1428_v17 = vpop.eup %1427  ;;  %928 = vst [vmem:[%s2051_s26 + $0x48] sm:$0xff] %v912_v10  ;;  %v911_v14 = vsel %vm671_vm0, %v1916_v22, %v895_v12 }
 0x393   : > { %v1430_v0 = vpop.eup %1429  ;;  %927 = vst [vmem:[%s2051_s26 + $0x40] sm:$0xff] %v911_v14  ;;  %v898_v1 = vmul.f32 %v1428_v17, %v2027_v7 }
 0x394   : > { %v897_v21 = vmul.f32 %v1430_v0, %v2029_v8 }
 0x395   : > { %v914_v18 = vsel %vm671_vm0, %v1922_v26, %v898_v1 }
 0x396   : > { %v1432_v24 = vpop.eup %1431  ;;  %930 = vst [vmem:[%s2051_s26 + $0x58] sm:$0xff] %v914_v18  ;;  %v913_v25 = vsel %vm671_vm0, %v1928_v30, %v897_v21 }
 0x397   : > { %v1434_v27 = vpop.eup %1433  ;;  %929 = vst [vmem:[%s2051_s26 + $0x50] sm:$0xff] %v913_v25  ;;  %v900_v22 = vmul.f32 %v1432_v24, %v2033_v13 }
 0x398   : > { %v899_v7 = vmul.f32 %v1434_v27, %v2035_v15 }
 0x399   : > { %v916_v8 = vsel %vm671_vm0, %v1934_v34, %v900_v22 }
 0x39a   : > { %v1436_v26 = vpop.eup %1435  ;;  %932 = vst [vmem:[%s2051_s26 + $0x68] sm:$0xff] %v916_v8  ;;  %v915_v30 = vsel %vm671_vm0, %v1940_v38, %v899_v7 }
 0x39b   : > { %v1438_v28 = vpop.eup %1437  ;;  %931 = vst [vmem:[%s2051_s26 + $0x60] sm:$0xff] %v915_v30  ;;  %v902_v13 = vmul.f32 %v1436_v26, %v2039_v19 }
 0x39c   : > { %v901_v15 = vmul.f32 %v1438_v28, %v2041_v20 }
 0x39d   : > { %v918_v34 = vsel %vm671_vm0, %v1946_v42, %v902_v13 }
 0x39e   : > { %934 = vst [vmem:[%s2051_s26 + $0x78] sm:$0xff] %v918_v34  ;;  %v917_v38 = vsel %vm671_vm0, %v1952_v46, %v901_v15 }
 0x39f   : > { %933 = vst [vmem:[%s2051_s26 + $0x70] sm:$0xff] %v917_v38 }
 0x3a0   : > { %1538 = shalt.err (!%p1535_p1)
}
 0x3a1   : > { %s1539_s19 = scalar_lea.hbm %s2126_s14, 2048  ;;  %s1543_s17 = scalar_lea.hbm %s2186_s6, 4096 }
 0x3a2   : > { %p1540_p13 = scmp.ne.s32.totalorder %s2126_s14, %s1539_s19  ;;  %p1544_p4 = scmp.lt.u32.totalorder %s2126_s14, %s2186_s6 }
 0x3a3   : > { %p1545_p5 = scmp.lt.u32.totalorder %s1543_s17, %s1539_s19  ;;  %p1547_p11 = scmp.lt.u32.totalorder %s1539_s19, %s2126_s14 }
 0x3a4   : > { %p1541_p6 = pnand %p1540_p13, %p2200_p0 }
 0x3a5   : > { %p1546_p8 = por %p1545_p5, %p1544_p4 }
 0x3a6   : > { %p1542_p10 = pneg %p1541_p6 }
 0x3a7   : > { %p1548_p2 = por %p1547_p11, %p1546_p8 }
 0x3a9   : > { %p1549_p3 = pnand %p1548_p2, %p1542_p10 }
 0x3ab   : > { %1552 = shalt.err (!%p1549_p3)
}
 0x3ac   : > { %s1603_s10 = smov 128   ;;  %s1604_s15 = smov 8  }
 0x3ad   : > { %1314 = dma.vmem_to_hbm [thread:$0]  (%p2200_p0), %s2128_s13, 2048, %s2126_s14, %s936_s25, %s1603_s10, %s1603_s10, %s1604_s15  }
 0x3ae PF: > { %s964_s7 = sand.u32 1, %s1583_s21   ;;  %p2201_p7 = scmp.ne.s32.totalorder %s2191_s28, 0 }
 0x3af   : > { %p2202_p9 = scmp.ge.s32.totalorder %s1595_s24, 2  ;;  %s965_s18 = scalar_lea.sflag [#allocation4], %s964_s7 }
 0x3b1   : > { %p1328_p12 = pnand %p2202_p9, %p2201_p7 }
 0x3b3   : > { %1578 = dma.done.wait (!%p1328_p12), %s965_s18, 2048  }
 0x3b4   : > { %1580 = vsyncadd (!%p1328_p12), %s965_s18, 4294965248  ;;  %p20_p1 = scmp.ge.s32.totalorder %s1756_s8, 4   ;;  %s2203_s21 = smov %s1587_s22 }
 0x3b5   : > { %s2204_s22 = smov %s1591_s23  ;;  %s2205_s23 = smov %s1772_s11 }
 0x3b6   : > { %s2206_s24 = smov %s1756_s8  ;;  %22 = sbr.rel (!%p20_p1) target bundleno = 6 (0x6), region = 97 }
 0x3bd   :  { %970 = vsyncpa [#allocation3], 1 }
 0x3be   :  { %972 = vsyncpa [#allocation3 + $0x1], 1 }
 0x3bf   :  { %973 = vsyncpa [#allocation6], 1 }
 0x3c0   :  { %974 = vsyncpa [#allocation4], 1 }
 0x3c1   :  { %976 = vsyncpa [#allocation4 + $0x1], 1 }

</bundles_post_ra>
